<compile_context>
chip_gen: v7x
topology: tpu7x:2x2x1
jax: 0.10.0
libtpu: 0.0.40
codegen_flags: <defaults>
</compile_context>

<pallas_src>
import jax
import jax.numpy as jnp
from jax import lax
from jax.experimental import pallas as pl
from jax.experimental.pallas import tpu as pltpu

_SUB_ROWS = 256          # in-kernel row sub-block (multiple of 8; 2x256-MXU friendly)
_LN_EPS = 1e-12


def _self_output_kernel(x_ref, wt_ref, b_ref, g_ref, be_ref, o_ref):
    # x_ref : (TM, D)  token rows, native/bf16 dtype
    # wt_ref: (D, D)   dense weight, PRE-TRANSPOSED to [in, out] in the wrapper
    # b_ref / g_ref / be_ref: (1, D) f32 bias / LayerNorm gamma / LayerNorm beta
    tm, d = x_ref.shape
    sub = _SUB_ROWS if tm % _SUB_ROWS == 0 else tm
    inv_d = jnp.float32(1.0 / d)

    w = wt_ref[...]          # hoisted: loaded once, reused by all sub-block dots
    bias = b_ref[...]
    gamma = g_ref[...]
    beta = be_ref[...]

    # Static unroll over row sub-blocks: LN epilogue of block i hides under the
    # vmatmul pushes of block i+1; keeps the live f32 intermediate small.
    for r0 in range(0, tm, sub):
        xs = x_ref[pl.ds(r0, sub), :]
        # y = xs @ W.T (PyTorch Linear) == xs @ wt, rhs contracted on its dim 0.
        y = lax.dot_general(
            xs, w,
            dimension_numbers=(((1,), (0,)), ((), ())),
            preferred_element_type=jnp.float32,
        )
        y = y + bias

        # Two-pass LayerNorm: mean, then centered second moment.  `c` is reused
        # for the normalized output, so this costs the same as the fused form
        # while avoiding E[y^2]-E[y]^2 cancellation.
        mean = jnp.sum(y, axis=-1, keepdims=True) * inv_d
        c = y - mean
        var = jnp.sum(c * c, axis=-1, keepdims=True) * inv_d
        inv_std = lax.rsqrt(var + jnp.float32(_LN_EPS))   # EUP slot, off the VALU path

        out = (c * inv_std) * gamma + beta
        # Dropout(eval) after LayerNorm == identity.
        o_ref[pl.ds(r0, sub), :] = out.astype(o_ref.dtype)


def _choose_tile_rows(m_rows: int) -> int:
    """Row-tile heuristic.

    Small problems run as a single full-extent block (always layout-legal).
    Real shapes use 512-row tiles (256-aligned for the v6e/v7x MXU, 128-aligned
    for v5e); on big-VMEM parts (v5e/v6e: 128 MiB) with enough rows we bump to
    1024 to halve per-step overhead.  v7x (64 MiB / TC) keeps 512 and grid >= 2
    so both TensorCores get work via the "parallel" grid axis.
    """
    if m_rows <= 512:
        return m_rows
    try:
        vmem_bytes = pltpu.get_tpu_info().vmem_capacity_bytes
    except Exception:                     # unknown part -> conservative sizing
        vmem_bytes = 64 * 1024 * 1024
    if vmem_bytes >= 100 * 1024 * 1024 and m_rows >= 2048:
        return 1024
    return 512


def _invariant_spec(shape, single_buffer: bool) -> pl.BlockSpec:
    index_map = lambda i: (0,) * len(shape)
    if single_buffer:
        # Grid-invariant operand: one VMEM buffer instead of the default two.
        return pl.BlockSpec(shape, index_map, pipeline_mode=pl.Buffered(1))
    return pl.BlockSpec(shape, index_map)


def bert_self_output(x, weight, bias, gamma, beta, *, tile_rows=None, mxu_dtype=None):
    """Forward of this module: dropout(LayerNorm(dense(x))), dropout = identity (eval).

    x:      [B, S, D]
    weight: [D, D]   PyTorch nn.Linear layout (out, in)
    bias, gamma, beta: [D]
    mxu_dtype: optionally cast x / weight (e.g. jnp.bfloat16) before the MXU;
               accumulation and the LayerNorm epilogue stay in f32.
    """
    B, S, D = x.shape
    M = B * S
    if mxu_dtype is not None:
        x = x.astype(mxu_dtype)
        weight = weight.astype(mxu_dtype)
    if tile_rows is None:
        tile_rows = _choose_tile_rows(M)

    grid_m = pl.cdiv(M, tile_rows)   # ragged last block handled by Pallas (no pad/slice)
    x2 = x.reshape(M, D)
    w_t = weight.T                   # one-time [out,in] -> [in,out] transpose, amortized
    b2 = bias.astype(jnp.float32).reshape(1, D)
    g2 = gamma.astype(jnp.float32).reshape(1, D)
    be2 = beta.astype(jnp.float32).reshape(1, D)

    # 32 MiB fits every generation (incl. v7x's 64 MiB physical VMEM); the
    # 1024-row tile is only selected on 128-MiB parts, where 64 MiB is safe.
    vmem_limit = (64 if tile_rows >= 1024 else 32) * 1024 * 1024

    def call(single_buffer: bool):
        return pl.pallas_call(
            _self_output_kernel,
            out_shape=jax.ShapeDtypeStruct((M, D), x.dtype),
            grid_spec=pltpu.PrefetchScalarGridSpec(
                num_scalar_prefetch=0,
                grid=(grid_m,),
                in_specs=[
                    pl.BlockSpec((tile_rows, D), lambda i: (i, 0)),  # x rows (pipelined)
                    _invariant_spec((D, D), single_buffer),          # weight (resident)
                    _invariant_spec((1, D), single_buffer),          # bias
                    _invariant_spec((1, D), single_buffer),          # gamma
                    _invariant_spec((1, D), single_buffer),          # beta
                ],
                out_specs=pl.BlockSpec((tile_rows, D), lambda i: (i, 0)),
            ),
            compiler_params=pltpu.CompilerParams(
                dimension_semantics=("parallel",),
                vmem_limit_bytes=vmem_limit,
            ),
        )(x2, w_t, b2, g2, be2)

    try:
        out2 = call(True)
    except Exception:
        # pipeline_mode=pl.Buffered(1) not accepted by this build: fall back to
        # default double-buffering (identical results, slightly more VMEM).
        out2 = call(False)

    return out2.reshape(B, S, D)


def _reference(x, weight, bias, gamma, beta):
    y = jnp.einsum("bsd,ed->bse", x.astype(jnp.float32), weight.astype(jnp.float32))
    y = y + bias.astype(jnp.float32)
    mean = jnp.mean(y, axis=-1, keepdims=True)
    var = jnp.mean((y - mean) ** 2, axis=-1, keepdims=True)
    yn = (y - mean) * lax.rsqrt(var + _LN_EPS)
    return yn * gamma.astype(jnp.float32) + beta.astype(jnp.float32)


if __name__ == "__main__":
    key = jax.random.PRNGKey(0)
    B, S, D = 2, 8, 32                 # batch=2, seq=8, d_model=32

    kx, kw, kb, kg, kbe = jax.random.split(key, 5)
    x = jax.random.normal(kx, (B, S, D), dtype=jnp.float32)
    # Deterministic "Linear" params (PyTorch layout: weight is [out, in])
    weight = jax.random.normal(kw, (D, D), dtype=jnp.float32) * (1.0 / jnp.sqrt(D))
    bias = jax.random.normal(kb, (D,), dtype=jnp.float32) * 0.02
    # LayerNorm affine params (PyTorch init: gamma=1, beta=0; perturb slightly)
    gamma = jnp.ones((D,), dtype=jnp.float32) + 0.01 * jax.random.normal(kg, (D,))
    beta = 0.01 * jax.random.normal(kbe, (D,), dtype=jnp.float32)

    ref = _reference(x, weight, bias, gamma, beta)

    # Native f32 path: tight tolerance.
    out = bert_self_output(x, weight, bias, gamma, beta)
    out = jax.block_until_ready(out)
    assert out.shape == (B, S, D)
    assert jnp.allclose(out, ref.astype(out.dtype), atol=1e-5, rtol=1e-5), \
        "f32 mismatch vs reference"

    # bf16 MXU-feed path (production config): loose tolerance, f32 epilogue.
    out_bf16 = bert_self_output(x, weight, bias, gamma, beta, mxu_dtype=jnp.bfloat16)
    out_bf16 = jax.block_until_ready(out_bf16)
    assert out_bf16.shape == (B, S, D)
    assert jnp.allclose(out_bf16.astype(jnp.float32), ref, atol=0.25, rtol=0.05), \
        "bf16 mismatch vs reference"

    print("KERNEL_OK")
</pallas_src>

<mosaic_0001>
module attributes {stable_mosaic.version = 11 : i64} {
  func.func @_self_output_kernel(%arg0: i32, %arg1: memref<16x32xf32, #tpu.memory_space<vmem>>, %arg2: memref<32x32xf32, #tpu.memory_space<vmem>>, %arg3: memref<1x32xf32, #tpu.memory_space<vmem>>, %arg4: memref<1x32xf32, #tpu.memory_space<vmem>>, %arg5: memref<1x32xf32, #tpu.memory_space<vmem>>, %arg6: memref<16x32xf32, #tpu.memory_space<vmem>>) attributes {dimension_semantics = [#tpu.dimension_semantics<parallel>], iteration_bounds = array<i64: 1>, scalar_prefetch = 0 : i64, scratch_operands = 0 : i64, tpu.core_type = #tpu.core_type<tc>, window_params = [{transform_indices = @transform_0, window_bounds = array<i64: 16, 32>}, {pipeline_mode = #tpu.pipeline_mode<synchronous>, transform_indices = @transform_1, window_bounds = array<i64: 32, 32>}, {pipeline_mode = #tpu.pipeline_mode<synchronous>, transform_indices = @transform_2, window_bounds = array<i64: 1, 32>}, {pipeline_mode = #tpu.pipeline_mode<synchronous>, transform_indices = @transform_3, window_bounds = array<i64: 1, 32>}, {pipeline_mode = #tpu.pipeline_mode<synchronous>, transform_indices = @transform_4, window_bounds = array<i64: 1, 32>}, {transform_indices = @transform_5, window_bounds = array<i64: 16, 32>}]} {
    %c0 = arith.constant 0 : index
    %c0_0 = arith.constant 0 : index
    %0 = vector.load %arg2[%c0, %c0_0] : memref<32x32xf32, #tpu.memory_space<vmem>>, vector<32x32xf32>
    %c0_1 = arith.constant 0 : index
    %c0_2 = arith.constant 0 : index
    %1 = vector.load %arg3[%c0_1, %c0_2] : memref<1x32xf32, #tpu.memory_space<vmem>>, vector<1x32xf32>
    %c0_3 = arith.constant 0 : index
    %c0_4 = arith.constant 0 : index
    %2 = vector.load %arg4[%c0_3, %c0_4] : memref<1x32xf32, #tpu.memory_space<vmem>>, vector<1x32xf32>
    %c0_5 = arith.constant 0 : index
    %c0_6 = arith.constant 0 : index
    %3 = vector.load %arg5[%c0_5, %c0_6] : memref<1x32xf32, #tpu.memory_space<vmem>>, vector<1x32xf32>
    %c0_7 = arith.constant 0 : index
    %c0_8 = arith.constant 0 : index
    %4 = vector.load %arg1[%c0_7, %c0_8] : memref<16x32xf32, #tpu.memory_space<vmem>>, vector<16x32xf32>
    %cst = arith.constant dense<0.000000e+00> : vector<16x32xf32>
    %5 = tpu.matmul %4, %0, %cst {dimension_numbers = #tpu.dot_dimension_numbers<[1], [0], [0], [1], [0, 0, 1, 1], [], []>} : vector<16x32xf32>, vector<32x32xf32>, vector<16x32xf32> -> vector<16x32xf32>
    %6 = vector.broadcast %1 : vector<1x32xf32> to vector<16x32xf32>
    %7 = arith.addf %5, %6 : vector<16x32xf32>
    %cst_9 = arith.constant dense<0.000000e+00> : vector<16xf32>
    %8 = vector.multi_reduction <add>, %7, %cst_9 [1] : vector<16x32xf32> to vector<16xf32>
    %9 = vector.shape_cast %8 : vector<16xf32> to vector<16x1xf32>
    %cst_10 = arith.constant 3.125000e-02 : f32
    %10 = vector.broadcast %cst_10 : f32 to vector<16x1xf32>
    %11 = arith.mulf %9, %10 : vector<16x1xf32>
    %12 = vector.broadcast %11 : vector<16x1xf32> to vector<16x32xf32>
    %13 = arith.subf %7, %12 : vector<16x32xf32>
    %14 = arith.mulf %13, %13 : vector<16x32xf32>
    %cst_11 = arith.constant dense<0.000000e+00> : vector<16xf32>
    %15 = vector.multi_reduction <add>, %14, %cst_11 [1] : vector<16x32xf32> to vector<16xf32>
    %16 = vector.shape_cast %15 : vector<16xf32> to vector<16x1xf32>
    %cst_12 = arith.constant 3.125000e-02 : f32
    %17 = vector.broadcast %cst_12 : f32 to vector<16x1xf32>
    %18 = arith.mulf %16, %17 : vector<16x1xf32>
    %cst_13 = arith.constant 9.99999996E-13 : f32
    %19 = vector.broadcast %cst_13 : f32 to vector<16x1xf32>
    %20 = arith.addf %18, %19 : vector<16x1xf32>
    %21 = math.rsqrt %20 : vector<16x1xf32>
    %22 = vector.broadcast %21 : vector<16x1xf32> to vector<16x32xf32>
    %23 = arith.mulf %13, %22 : vector<16x32xf32>
    %24 = vector.broadcast %2 : vector<1x32xf32> to vector<16x32xf32>
    %25 = arith.mulf %23, %24 : vector<16x32xf32>
    %26 = vector.broadcast %3 : vector<1x32xf32> to vector<16x32xf32>
    %27 = arith.addf %25, %26 : vector<16x32xf32>
    %c0_14 = arith.constant 0 : index
    %c0_15 = arith.constant 0 : index
    %28 = vector.load %arg6[%c0_14, %c0_15] : memref<16x32xf32, #tpu.memory_space<vmem>>, vector<16x32xf32>
    tpu.vector_store %arg6[%c0_14, %c0_15], %27 {strides = array<i32>} : memref<16x32xf32, #tpu.memory_space<vmem>>, vector<16x32xf32>,
    return
  }
  func.func @transform_0(%arg0: i32) -> (i32, i32) {
    %c0_i32 = arith.constant 0 : i32
    %c0_i32_0 = arith.constant 0 : i32
    return %arg0, %c0_i32 : i32, i32
  }
  func.func @transform_1(%arg0: i32) -> (i32, i32) {
    %c0_i32 = arith.constant 0 : i32
    %c0_i32_0 = arith.constant 0 : i32
    %c0_i32_1 = arith.constant 0 : i32
    return %c0_i32, %c0_i32_0 : i32, i32
  }
  func.func @transform_2(%arg0: i32) -> (i32, i32) {
    %c0_i32 = arith.constant 0 : i32
    %c0_i32_0 = arith.constant 0 : i32
    %c0_i32_1 = arith.constant 0 : i32
    return %c0_i32, %c0_i32_0 : i32, i32
  }
  func.func @transform_3(%arg0: i32) -> (i32, i32) {
    %c0_i32 = arith.constant 0 : i32
    %c0_i32_0 = arith.constant 0 : i32
    %c0_i32_1 = arith.constant 0 : i32
    return %c0_i32, %c0_i32_0 : i32, i32
  }
  func.func @transform_4(%arg0: i32) -> (i32, i32) {
    %c0_i32 = arith.constant 0 : i32
    %c0_i32_0 = arith.constant 0 : i32
    %c0_i32_1 = arith.constant 0 : i32
    return %c0_i32, %c0_i32_0 : i32, i32
  }
  func.func @transform_5(%arg0: i32) -> (i32, i32) {
    %c0_i32 = arith.constant 0 : i32
    %c0_i32_0 = arith.constant 0 : i32
    return %arg0, %c0_i32 : i32, i32
  }
}

module attributes {stable_mosaic.version = 11 : i64} {
  func.func @_self_output_kernel(%arg0: i32, %arg1: memref<16x32xf32, #tpu.memory_space<vmem>>, %arg2: memref<32x32xf32, #tpu.memory_space<vmem>>, %arg3: memref<1x32xf32, #tpu.memory_space<vmem>>, %arg4: memref<1x32xf32, #tpu.memory_space<vmem>>, %arg5: memref<1x32xf32, #tpu.memory_space<vmem>>, %arg6: memref<16x32xf32, #tpu.memory_space<vmem>>) attributes {dimension_semantics = [#tpu.dimension_semantics<parallel>], iteration_bounds = array<i64: 1>, scalar_prefetch = 0 : i64, scratch_operands = 0 : i64, tpu.core_type = #tpu.core_type<tc>, window_params = [{transform_indices = @transform_0, window_bounds = array<i64: 16, 32>}, {pipeline_mode = #tpu.pipeline_mode<synchronous>, transform_indices = @transform_1, window_bounds = array<i64: 32, 32>}, {pipeline_mode = #tpu.pipeline_mode<synchronous>, transform_indices = @transform_2, window_bounds = array<i64: 1, 32>}, {pipeline_mode = #tpu.pipeline_mode<synchronous>, transform_indices = @transform_3, window_bounds = array<i64: 1, 32>}, {pipeline_mode = #tpu.pipeline_mode<synchronous>, transform_indices = @transform_4, window_bounds = array<i64: 1, 32>}, {transform_indices = @transform_5, window_bounds = array<i64: 16, 32>}]} {
    %c0 = arith.constant 0 : index
    %c0_0 = arith.constant 0 : index
    %0 = vector.load %arg2[%c0, %c0_0] : memref<32x32xf32, #tpu.memory_space<vmem>>, vector<32x32xf32>
    %c0_1 = arith.constant 0 : index
    %c0_2 = arith.constant 0 : index
    %1 = vector.load %arg3[%c0_1, %c0_2] : memref<1x32xf32, #tpu.memory_space<vmem>>, vector<1x32xf32>
    %c0_3 = arith.constant 0 : index
    %c0_4 = arith.constant 0 : index
    %2 = vector.load %arg4[%c0_3, %c0_4] : memref<1x32xf32, #tpu.memory_space<vmem>>, vector<1x32xf32>
    %c0_5 = arith.constant 0 : index
    %c0_6 = arith.constant 0 : index
    %3 = vector.load %arg5[%c0_5, %c0_6] : memref<1x32xf32, #tpu.memory_space<vmem>>, vector<1x32xf32>
    %c0_7 = arith.constant 0 : index
    %c0_8 = arith.constant 0 : index
    %4 = vector.load %arg1[%c0_7, %c0_8] : memref<16x32xf32, #tpu.memory_space<vmem>>, vector<16x32xf32>
    %cst = arith.constant dense<0.000000e+00> : vector<16x32xf32>
    %5 = tpu.matmul %4, %0, %cst {dimension_numbers = #tpu.dot_dimension_numbers<[1], [0], [0], [1], [0, 0, 1, 1], [], []>} : vector<16x32xf32>, vector<32x32xf32>, vector<16x32xf32> -> vector<16x32xf32>
    %6 = vector.broadcast %1 : vector<1x32xf32> to vector<16x32xf32>
    %7 = arith.addf %5, %6 : vector<16x32xf32>
    %cst_9 = arith.constant dense<0.000000e+00> : vector<16xf32>
    %8 = vector.multi_reduction <add>, %7, %cst_9 [1] : vector<16x32xf32> to vector<16xf32>
    %9 = vector.shape_cast %8 : vector<16xf32> to vector<16x1xf32>
    %cst_10 = arith.constant 3.125000e-02 : f32
    %10 = vector.broadcast %cst_10 : f32 to vector<16x1xf32>
    %11 = arith.mulf %9, %10 : vector<16x1xf32>
    %12 = vector.broadcast %11 : vector<16x1xf32> to vector<16x32xf32>
    %13 = arith.subf %7, %12 : vector<16x32xf32>
    %14 = arith.mulf %13, %13 : vector<16x32xf32>
    %cst_11 = arith.constant dense<0.000000e+00> : vector<16xf32>
    %15 = vector.multi_reduction <add>, %14, %cst_11 [1] : vector<16x32xf32> to vector<16xf32>
    %16 = vector.shape_cast %15 : vector<16xf32> to vector<16x1xf32>
    %cst_12 = arith.constant 3.125000e-02 : f32
    %17 = vector.broadcast %cst_12 : f32 to vector<16x1xf32>
    %18 = arith.mulf %16, %17 : vector<16x1xf32>
    %cst_13 = arith.constant 9.99999996E-13 : f32
    %19 = vector.broadcast %cst_13 : f32 to vector<16x1xf32>
    %20 = arith.addf %18, %19 : vector<16x1xf32>
    %21 = math.rsqrt %20 : vector<16x1xf32>
    %22 = vector.broadcast %21 : vector<16x1xf32> to vector<16x32xf32>
    %23 = arith.mulf %13, %22 : vector<16x32xf32>
    %24 = vector.broadcast %2 : vector<1x32xf32> to vector<16x32xf32>
    %25 = arith.mulf %23, %24 : vector<16x32xf32>
    %26 = vector.broadcast %3 : vector<1x32xf32> to vector<16x32xf32>
    %27 = arith.addf %25, %26 : vector<16x32xf32>
    %c0_14 = arith.constant 0 : index
    %c0_15 = arith.constant 0 : index
    %28 = vector.load %arg6[%c0_14, %c0_15] : memref<16x32xf32, #tpu.memory_space<vmem>>, vector<16x32xf32>
    tpu.vector_store %arg6[%c0_14, %c0_15], %27 {strides = array<i32>} : memref<16x32xf32, #tpu.memory_space<vmem>>, vector<16x32xf32>,
    return
  }
  func.func @transform_0(%arg0: i32) -> (i32, i32) {
    %c0_i32 = arith.constant 0 : i32
    %c0_i32_0 = arith.constant 0 : i32
    return %arg0, %c0_i32 : i32, i32
  }
  func.func @transform_1(%arg0: i32) -> (i32, i32) {
    %c0_i32 = arith.constant 0 : i32
    %c0_i32_0 = arith.constant 0 : i32
    %c0_i32_1 = arith.constant 0 : i32
    return %c0_i32, %c0_i32_0 : i32, i32
  }
  func.func @transform_2(%arg0: i32) -> (i32, i32) {
    %c0_i32 = arith.constant 0 : i32
    %c0_i32_0 = arith.constant 0 : i32
    %c0_i32_1 = arith.constant 0 : i32
    return %c0_i32, %c0_i32_0 : i32, i32
  }
  func.func @transform_3(%arg0: i32) -> (i32, i32) {
    %c0_i32 = arith.constant 0 : i32
    %c0_i32_0 = arith.constant 0 : i32
    %c0_i32_1 = arith.constant 0 : i32
    return %c0_i32, %c0_i32_0 : i32, i32
  }
  func.func @transform_4(%arg0: i32) -> (i32, i32) {
    %c0_i32 = arith.constant 0 : i32
    %c0_i32_0 = arith.constant 0 : i32
    %c0_i32_1 = arith.constant 0 : i32
    return %c0_i32, %c0_i32_0 : i32, i32
  }
  func.func @transform_5(%arg0: i32) -> (i32, i32) {
    %c0_i32 = arith.constant 0 : i32
    %c0_i32_0 = arith.constant 0 : i32
    return %arg0, %c0_i32 : i32, i32
  }
}

</mosaic_0001>

<bundles_post_ra>
// kernel: tpu_custom_call.1
= control target key start
LH: loop header
LB: loop body
LE: loop exit
PB: predicated region body
PF: predicated region fallthrough
CT: control target
= control target key end

     0   :  { %10 = vsyncpa [#allocation3], 0  ;;  %s416_s0 = inlined_call_operand.hbm [shape: f32[16,32], index: 0, kind: input, shape index: {}]   ;;  %s417_s1 = inlined_call_operand.hbm [shape: f32[32,32], index: 1, kind: input, shape index: {}]   ;;  %s418_s2 = inlined_call_operand.vmem [shape: f32[1,32], index: 2, kind: input, shape index: {}]   ;;  %s419_s3 = inlined_call_operand.vmem [shape: f32[1,32], index: 3, kind: input, shape index: {}]   ;;  %s420_s4 = inlined_call_operand.vmem [shape: f32[1,32], index: 4, kind: input, shape index: {}]   ;;  %s421_s5 = inlined_call_operand.hbm [shape: f32[16,32], index: 5, kind: output, shape index: {}]  }
   0x1   :  { %11 = vsyncpa [#allocation6], 0 }
   0x2   :  { %12 = vsyncpa [#allocation4], 0  ;;  %s319_s18 = smov [#allocation2]   ;;  %s247_s22 = scalar_lea.hbm %s416_s0, 256 }
   0x3   :  { %s18_s19 = sshll.u32 %s319_s18, 4  ;;  %p248_p0 = scmp.ne.s32.totalorder %s416_s0, %s247_s22  ;;  %s19_s19 = int_to_ptr.vmem [resolvable:$true] %s18_s19 }
   0x4   :  { %p251_p1 = scmp.lt.u32.totalorder %s247_s22, %s416_s0 }
   0x6   :  { %p253_p2 = pnand %p251_p1, %p248_p0 }
   0x8   :  { %256 = shalt.err (!%p253_p2)
}
   0x9   :  { %s257_s27 = scalar_lea.vmem %s19_s19, 256  ;;  %p262_p4 = scmp.lt.s32.totalorder %s19_s19, %s19_s19 }
   0xa   :  { %p258_p3 = scmp.ne.s32.totalorder %s19_s19, %s257_s27  ;;  %p263_p5 = scmp.lt.s32.totalorder %s257_s27, %s257_s27 }
   0xc   :  { %p264_p6 = por %p263_p5, %p262_p4 }
   0xe   :  { %p265_p7 = pnand %p264_p6, %p258_p3 }
  0x10   :  { %268 = shalt.err (!%p265_p7)
}
  0x11   :  { %s320_s28 = smov 128   ;;  %s321_s29 = smov 8  }
  0x12   :  { %24 = dma.hbm_to_vmem [thread:$0]  %s416_s0, 256, %s19_s19, [#allocation3], %s320_s28, %s320_s28, %s321_s29  }
  0x13   :  { %s322_s7 = smov [#allocation5]   ;;  %s269_s11 = scalar_lea.hbm %s417_s1, 512 }
  0x14   :  { %s30_s8 = sshll.u32 %s322_s7, 4  ;;  %p270_p8 = scmp.ne.s32.totalorder %s417_s1, %s269_s11  ;;  %s31_s8 = int_to_ptr.vmem [resolvable:$true] %s30_s8 }
  0x15   :  { %p273_p9 = scmp.lt.u32.totalorder %s269_s11, %s417_s1 }
  0x17   :  { %p275_p10 = pnand %p273_p9, %p270_p8 }
  0x19   :  { %278 = shalt.err (!%p275_p10)
}
  0x1a   :  { %s279_s16 = scalar_lea.vmem %s31_s8, 512  ;;  %p284_p12 = scmp.lt.s32.totalorder %s31_s8, %s31_s8 }
  0x1b   :  { %p280_p11 = scmp.ne.s32.totalorder %s31_s8, %s279_s16  ;;  %p285_p13 = scmp.lt.s32.totalorder %s279_s16, %s279_s16 }
  0x1d   :  { %p286_p0 = por %p285_p13, %p284_p12 }
  0x1f   :  { %p287_p1 = pnand %p286_p0, %p280_p11 }
  0x21   :  { %290 = shalt.err (!%p287_p1)
}
  0x22   :  { %36 = dma.hbm_to_vmem [thread:$0]  %s417_s1, 512, %s31_s8, [#allocation6], %s320_s28, %s320_s28, %s321_s29  }
  0x23   :  { %313 = dma.done.wait [#allocation3], 256  }
  0x24   :  { %314 = vsyncadd [#allocation3], 4294967040 }
  0x25   :  { %315 = dma.done.wait [#allocation6], 512  }
  0x26   :  { %316 = vsyncadd [#allocation6], 4294966784  ;;  %vm64_vm0 = vcmask 261120   ;;  %v49_v0 = vld [vmem:[#allocation5] sm:$0xff]  ;;  %v50_v1 = vld [vmem:[#allocation5 + $0x8] sm:$0xff]  ;;  %s323_s22 = smov [#allocation7]  }
  0x27   :  { %v51_v2 = vld [vmem:[#allocation5 + $0x10] sm:$0xff]  ;;  %v230_v3 = vpack.c.bf16 %v50_v1, %v49_v0  ;;  %v52_v4 = vld [vmem:[#allocation5 + $0x18] sm:$0xff]  ;;  %s195_s23 = sshll.u32 %s323_s22, 4  ;;  %s196_s23 = int_to_ptr.vmem [resolvable:$true] %s195_s23 }
  0x28   :  { %v56_v5 = vld [vmem:[#allocation2] sm:$0xff]  ;;  %v234_v6 = vpack.c.bf16 %v52_v4, %v51_v2  ;;  %v57_v7 = vld [vmem:[#allocation2 + $0x8] sm:$0xff]  ;;  %s291_s24 = scalar_lea.vmem %s196_s23, 256  ;;  %p296_p3 = scmp.lt.s32.totalorder %s196_s23, %s196_s23 }
  0x29   :  { %227 = vmatprep.mubr.msk.f32.mxu0 %vm64_vm0, %v56_v5  ;;  %231 = vmatprep.subr.bf16.mxu0 %v230_v3  ;;  %v208_v8 = vld [vmem:[%s418_s2] ss:$0 sm:$0xff]  ;;  %p292_p2 = scmp.ne.s32.totalorder %s196_s23, %s291_s24  ;;  %p297_p4 = scmp.lt.s32.totalorder %s291_s24, %s291_s24 }
  0x2a   :  { %233 = vmatpush3.bf16.msra.mxu0 %v230_v3  ;;  %v211_v32 = vld [vmem:[%s419_s3] ss:$0 sm:$0xff] }
  0x2b   :  { %235 = vmatprep.subr.bf16.mxu0 %v234_v6  ;;  %v212_v34 = vld [vmem:[%s420_s4] ss:$0 sm:$0xff]  ;;  %p298_p5 = por %p297_p4, %p296_p3 }
  0x2d   :  { %p299_p6 = pnand %p298_p5, %p292_p2 }
  0x2e   :  { %237 = vmatpush3.bf16.msra.mxu0 %v234_v6 }
  0x31   :  { %228 = vmatmul.mubr.msk.f32.vlgmr.msra.gmra.mrb[0].mxu0 %vm64_vm0, %v57_v7 }
 0x104   :  { %v229_v9 = vpop.f32.mrb[0].mxu0 }
 0x105   :  { %v137_v10 = vpop.f32.mrb[1].mxu0  ;;  %v143_v12 = vadd.f32 %v229_v9, %v208_v8 }
 0x106   :  { %v138_v11 = vadd.f32 %v208_v8, %v137_v10 }
 0x107   :  { %v149_v14 = vsel %vm64_vm0, %v143_v12, 0.0 }
 0x108   :  { %v146_v13 = vsel %vm64_vm0, %v138_v11, 0.0 }
 0x109   :  { %147 = vadd.xlane.f32.xlu0 %v146_v13 }
 0x10d   :  { %150 = vadd.xlane.f32.xlu0 %v149_v14 }
 0x196   :  { %v148_v15 = vpop.xlane.xlu0 %147 }
 0x197   :  { %v152_v16 = vmul.f32 0.03125, %v148_v15 }
 0x199   :  { %v154_v17 = vsub.f32 %v138_v11, %v152_v16 }
 0x19a   :  { %v151_v18 = vpop.xlane.xlu0 %150 }
 0x19b   :  { %v153_v19 = vmul.f32 0.03125, %v151_v18  ;;  %v156_v20 = vmul.f32 %v154_v17, %v154_v17 }
 0x19d   :  { %v155_v21 = vsub.f32 %v143_v12, %v153_v19  ;;  %v158_v22 = vsel %vm64_vm0, %v156_v20, 0.0 }
 0x19e   :  { %159 = vadd.xlane.f32.xlu1 %v158_v22 }
 0x19f   :  { %v157_v23 = vmul.f32 %v155_v21, %v155_v21 }
 0x1a1   :  { %v161_v24 = vsel %vm64_vm0, %v157_v23, 0.0 }
 0x1a2   :  { %162 = vadd.xlane.f32.xlu1 %v161_v24 }
 0x22b   :  { %v160_v25 = vpop.xlane.xlu1 %159 }
 0x22c   :  { %v164_v26 = vmul.f32 0.03125, %v160_v25 }
 0x22e   :  { %v166_v27 = vadd.f32 1e-12, %v164_v26 }
 0x22f   :  { %v163_v28 = vpop.xlane.xlu1 %162 }
 0x230   :  { %243 = vrsqrt.f32 %v166_v27  ;;  %v165_v29 = vmul.f32 0.03125, %v163_v28 }
 0x232   :  { %v167_v30 = vadd.f32 1e-12, %v165_v29 }
 0x234   :  { %245 = vrsqrt.f32 %v167_v30 }
 0x23a   :  { %v244_v31 = vpop.eup %243 }
 0x23b   :  { %v170_v33 = vmul.f32 %v244_v31, %v154_v17 }
 0x23d   :  { %v178_v35 = vmul.f32 %v211_v32, %v170_v33 }
 0x23e   :  { %v246_v36 = vpop.eup %245 }
 0x23f   :  { %v171_v37 = vmul.f32 %v246_v36, %v155_v21  ;;  %v186_v38 = vadd.f32 %v212_v34, %v178_v35 }
 0x241   :  { %v179_v39 = vmul.f32 %v211_v32, %v171_v37  ;;  %188 = vst.msk [vmem:[#allocation7] sm:$0xff] %vm64_vm0, %v186_v38 }
 0x243   :  { %v187_v40 = vadd.f32 %v212_v34, %v179_v39 }
 0x245   :  { %189 = vst.msk [vmem:[#allocation7 + $0x8] sm:$0xff] %vm64_vm0, %v187_v40 }
 0x246   :  { %302 = shalt.err (!%p299_p6)
}
 0x247   :  { %s303_s25 = scalar_lea.hbm %s421_s5, 256 }
 0x248   :  { %p304_p7 = scmp.ne.s32.totalorder %s421_s5, %s303_s25  ;;  %p307_p8 = scmp.lt.u32.totalorder %s303_s25, %s421_s5 }
 0x24a   :  { %p309_p9 = pnand %p307_p8, %p304_p7 }
 0x24c   :  { %312 = shalt.err (!%p309_p9)
}
 0x24d   :  { %201 = dma.vmem_to_hbm [thread:$0]  %s196_s23, 256, %s421_s5, [#allocation4], %s320_s28, %s320_s28, %s321_s29  }
 0x24e   :  { %317 = dma.done.wait [#allocation4], 256  }
 0x24f   :  { %318 = vsyncadd [#allocation4], 4294967040 }
 0x250   :  { %205 = vsyncpa [#allocation3], 1 }
 0x251   :  { %206 = vsyncpa [#allocation6], 1 }
 0x252   :  { %207 = vsyncpa [#allocation4], 1 }

// kernel: tpu_custom_call.1
= control target key start
LH: loop header
LB: loop body
LE: loop exit
PB: predicated region body
PF: predicated region fallthrough
CT: control target
= control target key end

     0   :  { %10 = vsyncpa [#allocation3], 0  ;;  %s416_s0 = inlined_call_operand.hbm [shape: f32[16,32], index: 0, kind: input, shape index: {}]   ;;  %s417_s1 = inlined_call_operand.hbm [shape: f32[32,32], index: 1, kind: input, shape index: {}]   ;;  %s418_s2 = inlined_call_operand.vmem [shape: f32[1,32], index: 2, kind: input, shape index: {}]   ;;  %s419_s3 = inlined_call_operand.vmem [shape: f32[1,32], index: 3, kind: input, shape index: {}]   ;;  %s420_s4 = inlined_call_operand.vmem [shape: f32[1,32], index: 4, kind: input, shape index: {}]   ;;  %s421_s5 = inlined_call_operand.hbm [shape: f32[16,32], index: 5, kind: output, shape index: {}]  }
   0x1   :  { %11 = vsyncpa [#allocation6], 0 }
   0x2   :  { %12 = vsyncpa [#allocation4], 0  ;;  %s319_s18 = smov [#allocation2]   ;;  %s247_s22 = scalar_lea.hbm %s416_s0, 256 }
   0x3   :  { %s18_s19 = sshll.u32 %s319_s18, 4  ;;  %p248_p0 = scmp.ne.s32.totalorder %s416_s0, %s247_s22  ;;  %s19_s19 = int_to_ptr.vmem [resolvable:$true] %s18_s19 }
   0x4   :  { %p251_p1 = scmp.lt.u32.totalorder %s247_s22, %s416_s0 }
   0x6   :  { %p253_p2 = pnand %p251_p1, %p248_p0 }
   0x8   :  { %256 = shalt.err (!%p253_p2)
}
   0x9   :  { %s257_s27 = scalar_lea.vmem %s19_s19, 256  ;;  %p262_p4 = scmp.lt.s32.totalorder %s19_s19, %s19_s19 }
   0xa   :  { %p258_p3 = scmp.ne.s32.totalorder %s19_s19, %s257_s27  ;;  %p263_p5 = scmp.lt.s32.totalorder %s257_s27, %s257_s27 }
   0xc   :  { %p264_p6 = por %p263_p5, %p262_p4 }
   0xe   :  { %p265_p7 = pnand %p264_p6, %p258_p3 }
  0x10   :  { %268 = shalt.err (!%p265_p7)
}
  0x11   :  { %s320_s28 = smov 128   ;;  %s321_s29 = smov 8  }
  0x12   :  { %24 = dma.hbm_to_vmem [thread:$0]  %s416_s0, 256, %s19_s19, [#allocation3], %s320_s28, %s320_s28, %s321_s29  }
  0x13   :  { %s322_s7 = smov [#allocation5]   ;;  %s269_s11 = scalar_lea.hbm %s417_s1, 512 }
  0x14   :  { %s30_s8 = sshll.u32 %s322_s7, 4  ;;  %p270_p8 = scmp.ne.s32.totalorder %s417_s1, %s269_s11  ;;  %s31_s8 = int_to_ptr.vmem [resolvable:$true] %s30_s8 }
  0x15   :  { %p273_p9 = scmp.lt.u32.totalorder %s269_s11, %s417_s1 }
  0x17   :  { %p275_p10 = pnand %p273_p9, %p270_p8 }
  0x19   :  { %278 = shalt.err (!%p275_p10)
}
  0x1a   :  { %s279_s16 = scalar_lea.vmem %s31_s8, 512  ;;  %p284_p12 = scmp.lt.s32.totalorder %s31_s8, %s31_s8 }
  0x1b   :  { %p280_p11 = scmp.ne.s32.totalorder %s31_s8, %s279_s16  ;;  %p285_p13 = scmp.lt.s32.totalorder %s279_s16, %s279_s16 }
  0x1d   :  { %p286_p0 = por %p285_p13, %p284_p12 }
  0x1f   :  { %p287_p1 = pnand %p286_p0, %p280_p11 }
  0x21   :  { %290 = shalt.err (!%p287_p1)
}
  0x22   :  { %36 = dma.hbm_to_vmem [thread:$0]  %s417_s1, 512, %s31_s8, [#allocation6], %s320_s28, %s320_s28, %s321_s29  }
  0x23   :  { %313 = dma.done.wait [#allocation3], 256  }
  0x24   :  { %314 = vsyncadd [#allocation3], 4294967040 }
  0x25   :  { %315 = dma.done.wait [#allocation6], 512  }
  0x26   :  { %316 = vsyncadd [#allocation6], 4294966784  ;;  %vm64_vm0 = vcmask 261120   ;;  %v49_v0 = vld [vmem:[#allocation5] sm:$0xff]  ;;  %v50_v1 = vld [vmem:[#allocation5 + $0x8] sm:$0xff]  ;;  %s323_s22 = smov [#allocation7]  }
  0x27   :  { %v51_v2 = vld [vmem:[#allocation5 + $0x10] sm:$0xff]  ;;  %v230_v3 = vpack.c.bf16 %v50_v1, %v49_v0  ;;  %v52_v4 = vld [vmem:[#allocation5 + $0x18] sm:$0xff]  ;;  %s195_s23 = sshll.u32 %s323_s22, 4  ;;  %s196_s23 = int_to_ptr.vmem [resolvable:$true] %s195_s23 }
  0x28   :  { %v56_v5 = vld [vmem:[#allocation2] sm:$0xff]  ;;  %v234_v6 = vpack.c.bf16 %v52_v4, %v51_v2  ;;  %v57_v7 = vld [vmem:[#allocation2 + $0x8] sm:$0xff]  ;;  %s291_s24 = scalar_lea.vmem %s196_s23, 256  ;;  %p296_p3 = scmp.lt.s32.totalorder %s196_s23, %s196_s23 }
  0x29   :  { %227 = vmatprep.mubr.msk.f32.mxu0 %vm64_vm0, %v56_v5  ;;  %231 = vmatprep.subr.bf16.mxu0 %v230_v3  ;;  %v208_v8 = vld [vmem:[%s418_s2] ss:$0 sm:$0xff]  ;;  %p292_p2 = scmp.ne.s32.totalorder %s196_s23, %s291_s24  ;;  %p297_p4 = scmp.lt.s32.totalorder %s291_s24, %s291_s24 }
  0x2a   :  { %233 = vmatpush3.bf16.msra.mxu0 %v230_v3  ;;  %v211_v32 = vld [vmem:[%s419_s3] ss:$0 sm:$0xff] }
  0x2b   :  { %235 = vmatprep.subr.bf16.mxu0 %v234_v6  ;;  %v212_v34 = vld [vmem:[%s420_s4] ss:$0 sm:$0xff]  ;;  %p298_p5 = por %p297_p4, %p296_p3 }
  0x2d   :  { %p299_p6 = pnand %p298_p5, %p292_p2 }
  0x2e   :  { %237 = vmatpush3.bf16.msra.mxu0 %v234_v6 }
  0x31   :  { %228 = vmatmul.mubr.msk.f32.vlgmr.msra.gmra.mrb[0].mxu0 %vm64_vm0, %v57_v7 }
 0x104   :  { %v229_v9 = vpop.f32.mrb[0].mxu0 }
 0x105   :  { %v137_v10 = vpop.f32.mrb[1].mxu0  ;;  %v143_v12 = vadd.f32 %v229_v9, %v208_v8 }
 0x106   :  { %v138_v11 = vadd.f32 %v208_v8, %v137_v10 }
 0x107   :  { %v149_v14 = vsel %vm64_vm0, %v143_v12, 0.0 }
 0x108   :  { %v146_v13 = vsel %vm64_vm0, %v138_v11, 0.0 }
 0x109   :  { %147 = vadd.xlane.f32.xlu0 %v146_v13 }
 0x10d   :  { %150 = vadd.xlane.f32.xlu0 %v149_v14 }
 0x196   :  { %v148_v15 = vpop.xlane.xlu0 %147 }
 0x197   :  { %v152_v16 = vmul.f32 0.03125, %v148_v15 }
 0x199   :  { %v154_v17 = vsub.f32 %v138_v11, %v152_v16 }
 0x19a   :  { %v151_v18 = vpop.xlane.xlu0 %150 }
 0x19b   :  { %v153_v19 = vmul.f32 0.03125, %v151_v18  ;;  %v156_v20 = vmul.f32 %v154_v17, %v154_v17 }
 0x19d   :  { %v155_v21 = vsub.f32 %v143_v12, %v153_v19  ;;  %v158_v22 = vsel %vm64_vm0, %v156_v20, 0.0 }
 0x19e   :  { %159 = vadd.xlane.f32.xlu1 %v158_v22 }
 0x19f   :  { %v157_v23 = vmul.f32 %v155_v21, %v155_v21 }
 0x1a1   :  { %v161_v24 = vsel %vm64_vm0, %v157_v23, 0.0 }
 0x1a2   :  { %162 = vadd.xlane.f32.xlu1 %v161_v24 }
 0x22b   :  { %v160_v25 = vpop.xlane.xlu1 %159 }
 0x22c   :  { %v164_v26 = vmul.f32 0.03125, %v160_v25 }
 0x22e   :  { %v166_v27 = vadd.f32 1e-12, %v164_v26 }
 0x22f   :  { %v163_v28 = vpop.xlane.xlu1 %162 }
 0x230   :  { %243 = vrsqrt.f32 %v166_v27  ;;  %v165_v29 = vmul.f32 0.03125, %v163_v28 }
 0x232   :  { %v167_v30 = vadd.f32 1e-12, %v165_v29 }
 0x234   :  { %245 = vrsqrt.f32 %v167_v30 }
 0x23a   :  { %v244_v31 = vpop.eup %243 }
 0x23b   :  { %v170_v33 = vmul.f32 %v244_v31, %v154_v17 }
 0x23d   :  { %v178_v35 = vmul.f32 %v211_v32, %v170_v33 }
 0x23e   :  { %v246_v36 = vpop.eup %245 }
 0x23f   :  { %v171_v37 = vmul.f32 %v246_v36, %v155_v21  ;;  %v186_v38 = vadd.f32 %v212_v34, %v178_v35 }
 0x241   :  { %v179_v39 = vmul.f32 %v211_v32, %v171_v37  ;;  %188 = vst.msk [vmem:[#allocation7] sm:$0xff] %vm64_vm0, %v186_v38 }
 0x243   :  { %v187_v40 = vadd.f32 %v212_v34, %v179_v39 }
 0x245   :  { %189 = vst.msk [vmem:[#allocation7 + $0x8] sm:$0xff] %vm64_vm0, %v187_v40 }
 0x246   :  { %302 = shalt.err (!%p299_p6)
}
 0x247   :  { %s303_s25 = scalar_lea.hbm %s421_s5, 256 }
 0x248   :  { %p304_p7 = scmp.ne.s32.totalorder %s421_s5, %s303_s25  ;;  %p307_p8 = scmp.lt.u32.totalorder %s303_s25, %s421_s5 }
 0x24a   :  { %p309_p9 = pnand %p307_p8, %p304_p7 }
 0x24c   :  { %312 = shalt.err (!%p309_p9)
}
 0x24d   :  { %201 = dma.vmem_to_hbm [thread:$0]  %s196_s23, 256, %s421_s5, [#allocation4], %s320_s28, %s320_s28, %s321_s29  }
 0x24e   :  { %317 = dma.done.wait [#allocation4], 256  }
 0x24f   :  { %318 = vsyncadd [#allocation4], 4294967040 }
 0x250   :  { %205 = vsyncpa [#allocation3], 1 }
 0x251   :  { %206 = vsyncpa [#allocation6], 1 }
 0x252   :  { %207 = vsyncpa [#allocation4], 1 }

</bundles_post_ra>
